<compile_context>
chip_gen: v6e
topology: v6e:2x2x1
jax: 0.10.0
libtpu: 0.0.40
codegen_flags: <defaults>
</compile_context>

<pallas_src>
import jax
import jax.numpy as jnp
from jax.experimental import pallas as pl
from jax.experimental.pallas import tpu as pltpu

_LANE = 128       # lane width of a vreg
_SUBLANE = 8      # sublane depth of a 32-bit vreg
_MAX_TILE = 2048  # lane-tile size for large inputs (big tiles ~ HBM roofline)
_NUM_BOX_PARAMS = 7


def _round_up(x, m):
    return (x + m - 1) // m * m


# ----------------------------------------------------------------------------
# Pallas kernel: bulk lane-dense copy of a packed (8, tile) parameter slab.
# Input/output are (sublane=8, lane=tile) tiles, so the store is a single
# unmasked bulk copy per grid step.
# ----------------------------------------------------------------------------
def _pack_slab_kernel(x_ref, o_ref):
    o_ref[...] = x_ref[...]


def _lane_dense_slab(x):
    """(B, K, 7) -> lane-dense packed slab (8, L_pad) via a Pallas copy.

    Rows 0..6 of the slab hold the 7 box parameters, columns 0..B*K-1 hold the
    flattened (batch, row) index on the lane axis.
    """
    B, K, D = x.shape
    L = B * K

    # (B, K, D) -> (D, B*K): long axis on lanes, params on sublanes.
    xt = jnp.transpose(x, (2, 0, 1)).reshape(D, L)

    # Pad sublanes 7 -> 8 and lanes to a multiple of the tile size.
    l128 = _round_up(L, _LANE)
    tile = min(_MAX_TILE, l128)
    l_pad = _round_up(l128, tile)
    xt = jnp.pad(xt, ((0, _SUBLANE - D), (0, l_pad - L)))

    grid = (l_pad // tile,)
    slab = pl.pallas_call(
        _pack_slab_kernel,
        out_shape=jax.ShapeDtypeStruct((_SUBLANE, l_pad), x.dtype),
        grid_spec=pltpu.PrefetchScalarGridSpec(
            num_scalar_prefetch=0,
            grid=grid,
            in_specs=[pl.BlockSpec((_SUBLANE, tile), lambda i: (0, i))],
            out_specs=pl.BlockSpec((_SUBLANE, tile), lambda i: (0, i)),
        ),
        compiler_params=pltpu.CompilerParams(
            dimension_semantics=("parallel",)),
    )(xt)
    return slab, (B, K, L)


def _split_slab(slab, B, K, L, dtype):
    """Cheap XLA split of the packed slab back into (center, wlh, yaw)."""
    valid = slab[:_NUM_BOX_PARAMS, :L]                    # (7, B*K)
    full = jnp.transpose(valid.reshape(_NUM_BOX_PARAMS, B, K),
                         (1, 2, 0)).astype(dtype)         # (B, K, 7)
    center = full[..., 0:3]
    wlh = full[..., 3:6]
    yaw = full[..., 6:7]
    return center, wlh, yaw


class ProposalLoss:
    """JAX/Pallas port of pvrcnn ProposalLoss."""

    def __init__(self, cfg):
        self.cfg = cfg
        self.anchors = cfg["ANCHORS"]

    def compute_label(self, predictions, boxes, class_idx, mask):
        """
        predictions of shape (B, N, D)
        groundtruth  of shape (B, M, D)

        class_idx / mask are accepted (as in the PyTorch signature) but are
        unused by the original compute_label body.
        """
        del class_idx, mask  # unused in the reference implementation
        B, N, D = predictions.shape
        _, M, _ = boxes.shape
        assert D == _NUM_BOX_PARAMS, \
            "box parameterisation is (x, y, z, w, l, h, yaw)"
        dtype = predictions.dtype

        pred_slab, (pb, pk, pl_len) = _lane_dense_slab(predictions)
        box_slab, (bb, bk, bl_len) = _lane_dense_slab(boxes)

        center_pred, wlh_pred, yaw_pred = _split_slab(
            pred_slab, pb, pk, pl_len, dtype)
        center_true, wlh_true, yaw_true = _split_slab(
            box_slab, bb, bk, bl_len, boxes.dtype)

        # NOTE: the reference compute_label returns None; the sliced tensors
        # are returned here so the kernel's work is observable.
        return (center_pred, wlh_pred, yaw_pred,
                center_true, wlh_true, yaw_true)

    def forward(self, predictions, boxes, class_idx, mask):
        # Faithful to the reference module.
        raise NotImplementedError

    def __call__(self, *args, **kwargs):
        return self.forward(*args, **kwargs)


if __name__ == "__main__":
    key = jax.random.PRNGKey(0)
    k_pred, k_box, k_cls, k_mask, k_anchor = jax.random.split(key, 5)

    B, N, M, D = 2, 8, 8, 7
    NUM_CLASSES = 3

    # Deterministic synthetic config (cfg.ANCHORS): one anchor per class.
    cfg = {
        "ANCHORS": jax.random.uniform(k_anchor, (NUM_CLASSES, D),
                                      dtype=jnp.float32),
    }

    predictions = jax.random.normal(k_pred, (B, N, D), dtype=jnp.float32)
    boxes = jax.random.normal(k_box, (B, M, D), dtype=jnp.float32)
    class_idx = jax.random.randint(k_cls, (B, M), 0, NUM_CLASSES,
                                   dtype=jnp.int32)
    mask = jax.random.bernoulli(k_mask, 0.5, (B, M))

    loss_mod = ProposalLoss(cfg)
    outs = loss_mod.compute_label(predictions, boxes, class_idx, mask)
    outs = jax.block_until_ready(outs)

    (center_pred, wlh_pred, yaw_pred,
     center_true, wlh_true, yaw_true) = outs

    # Correctness check against plain-JAX slicing semantics.
    assert jnp.allclose(center_pred, predictions[..., 0:3])
    assert jnp.allclose(wlh_pred, predictions[..., 3:6])
    assert jnp.allclose(yaw_pred, predictions[..., 6:7])
    assert jnp.allclose(center_true, boxes[..., 0:3])
    assert jnp.allclose(wlh_true, boxes[..., 3:6])
    assert jnp.allclose(yaw_true, boxes[..., 6:7])

    print("KERNEL_OK")
</pallas_src>

<mosaic_0001>
module attributes {stable_mosaic.version = 11 : i64} {
  func.func @_pack_slab_kernel(%arg0: i32, %arg1: memref<8x128xf32, #tpu.memory_space<vmem>>, %arg2: memref<8x128xf32, #tpu.memory_space<vmem>>) attributes {dimension_semantics = [#tpu.dimension_semantics<parallel>], iteration_bounds = array<i64: 1>, scalar_prefetch = 0 : i64, scratch_operands = 0 : i64, tpu.core_type = #tpu.core_type<tc>, window_params = [{transform_indices = @transform_0, window_bounds = array<i64: 8, 128>}, {transform_indices = @transform_1, window_bounds = array<i64: 8, 128>}]} {
    %c0 = arith.constant 0 : index
    %c0_0 = arith.constant 0 : index
    %0 = vector.load %arg1[%c0, %c0_0] : memref<8x128xf32, #tpu.memory_space<vmem>>, vector<8x128xf32>
    %c0_1 = arith.constant 0 : index
    %c0_2 = arith.constant 0 : index
    %1 = vector.load %arg2[%c0_1, %c0_2] : memref<8x128xf32, #tpu.memory_space<vmem>>, vector<8x128xf32>
    tpu.vector_store %arg2[%c0_1, %c0_2], %0 {strides = array<i32>} : memref<8x128xf32, #tpu.memory_space<vmem>>, vector<8x128xf32>,
    return
  }
  func.func @transform_0(%arg0: i32) -> (i32, i32) {
    %c0_i32 = arith.constant 0 : i32
    %c0_i32_0 = arith.constant 0 : i32
    return %c0_i32, %arg0 : i32, i32
  }
  func.func @transform_1(%arg0: i32) -> (i32, i32) {
    %c0_i32 = arith.constant 0 : i32
    %c0_i32_0 = arith.constant 0 : i32
    return %c0_i32, %arg0 : i32, i32
  }
}

</mosaic_0001>

<bundles_post_ra>
// kernel: tpu_custom_call.1
= control target key start
LH: loop header
LB: loop body
LE: loop exit
PB: predicated region body
PF: predicated region fallthrough
CT: control target
= control target key end

     0   :  { %6 = vsyncpa [#allocation3], 0  ;;  %s102_s0 = inlined_call_operand.hbm [shape: f32[8,128], index: 0, kind: input, shape index: {}]   ;;  %s103_s1 = inlined_call_operand.hbm [shape: f32[8,128], index: 1, kind: output, shape index: {}]  }
   0x1   :  { %7 = vsyncpa [#allocation4], 0  ;;  %s84_s6 = smov [#allocation2]  }
   0x2   :  { %s14_s7 = sshll.u32 %s84_s6, 4  ;;  %s15_s7 = int_to_ptr.vmem [resolvable:$true] %s14_s7 }
   0x3   :  { %s48_s8 = scalar_lea.vmem %s15_s7, 128  ;;  %p53_p1 = scmp.lt.s32.totalorder %s15_s7, %s15_s7 }
   0x4   :  { %p49_p0 = scmp.ne.s32.totalorder %s15_s7, %s48_s8  ;;  %p54_p2 = scmp.lt.s32.totalorder %s48_s8, %s48_s8 }
   0x6   :  { %p55_p3 = por %p54_p2, %p53_p1 }
   0x8   :  { %p56_p4 = pnand %p55_p3, %p49_p0 }
   0xa   :  { %59 = shalt.err (!%p56_p4)
}
   0xb   :  { %17 = dma.hbm_to_vmem [thread:$0]  %s102_s0, 128, %s15_s7, [#allocation3]  }
   0xc   :  { %80 = dma.done.wait [#allocation3], 128  }
   0xd   :  { %81 = vsyncadd [#allocation3], 4294967168  ;;  %s85_s11 = smov [#allocation5]   ;;  %v21_v0 = vld [vmem:[#allocation2] sm:$0xff] }
   0xe   :  { %s29_s12 = sshll.u32 %s85_s11, 4  ;;  %22 = vst [vmem:[#allocation5] sm:$0xff] %v21_v0  ;;  %s30_s12 = int_to_ptr.vmem [resolvable:$true] %s29_s12 }
   0xf   :  { %s60_s13 = scalar_lea.vmem %s30_s12, 128  ;;  %p65_p6 = scmp.lt.s32.totalorder %s30_s12, %s30_s12 }
  0x10   :  { %p61_p5 = scmp.ne.s32.totalorder %s30_s12, %s60_s13  ;;  %p66_p7 = scmp.lt.s32.totalorder %s60_s13, %s60_s13 }
  0x12   :  { %p67_p8 = por %p66_p7, %p65_p6 }
  0x14   :  { %p68_p9 = pnand %p67_p8, %p61_p5 }
  0x16   :  { %71 = shalt.err (!%p68_p9)
}
  0x17   :  { %32 = dma.vmem_to_hbm [thread:$0]  %s30_s12, 128, %s103_s1, [#allocation4]  }
  0x18   :  { %82 = dma.done.wait [#allocation4], 128  }
  0x19   :  { %83 = vsyncadd [#allocation4], 4294967168 }
  0x1a   :  { %36 = vsyncpa [#allocation3], 1 }
  0x1b   :  { %37 = vsyncpa [#allocation4], 1 }

</bundles_post_ra>
